<compile_context>
chip_gen: v5e
topology: v5e:2x2
jax: 0.10.0
libtpu: 0.0.40
codegen_flags: <defaults>
</compile_context>

<pallas_src>
import functools
import math

import jax
import jax.numpy as jnp
from jax.experimental import pallas as pl
from jax.experimental.pallas import tpu as pltpu


def _round_up(x, m):
    return ((x + m - 1) // m) * m


def _actor_critic_kernel(n_actions, x_ref, w1_ref, b1_ref, wh_ref, bh_ref,
                         pi_ref, v_ref):
    # fc1 + ReLU: bf16 x bf16 -> f32 accumulation on the MXU.
    h = jnp.dot(x_ref[...], w1_ref[...], preferred_element_type=jnp.float32)
    h = jnp.maximum(h + b1_ref[...], 0.0)                       # [TB, H] f32

    # Fused policy+value head.  Lanes 0..A-1 = pi logits, lane A = value,
    # lanes > A carry a -1e30 bias (baked in pack_params) so they vanish from
    # the softmax without an explicit padding mask.
    logits = jnp.dot(h.astype(wh_ref.dtype), wh_ref[...],
                     preferred_element_type=jnp.float32)
    logits = logits + bh_ref[...]                               # [TB, 128] f32

    out_pad = pi_ref.shape[-1]
    lane = jax.lax.broadcasted_iota(jnp.int32, (1, out_pad), 1)
    is_v = lane == n_actions                                    # single compare

    # Numerically-stable softmax over the action lanes; the value lane is
    # masked here and the padding lanes are already at -1e30.
    masked = jnp.where(is_v, -1e30, logits)
    m = jnp.max(masked, axis=-1, keepdims=True)
    e = jnp.exp(masked - m)                  # exactly 0 on value/padding lanes
    denom = jnp.sum(e, axis=-1, keepdims=True)
    pi = e * pl.reciprocal(denom, approx=False)

    # Lane-dense bf16 store of pi (value/padding lanes hold 0); f32 value col.
    pi_ref[...] = pi.astype(pi_ref.dtype)
    v_ref[...] = jnp.sum(jnp.where(is_v, logits, 0.0), axis=-1, keepdims=True)


def pack_params(w1, b1, wpi, bpi, wv, bv):
    """One-time fusion of the two heads into a single 128-lane-padded matmul.

    Padding lanes (> n_actions) get a -1e30 bias so the kernel does not need
    an explicit action mask for the softmax.
    """
    H, A = wpi.shape
    out_pad = _round_up(A + 1, 128)
    w_head = jnp.zeros((H, out_pad), jnp.float32)
    w_head = w_head.at[:, :A].set(wpi).at[:, A].set(wv[:, 0])
    b_head = jnp.full((1, out_pad), -1e30, jnp.float32)
    b_head = b_head.at[:, :A].set(bpi).at[:, A].set(bv[:, 0])
    return w1, b1, w_head, b_head


def actor_critic_forward(x, w1, b1, w_head, b_head, *, n_actions):
    B, D = x.shape
    H = w1.shape[1]
    out_pad = w_head.shape[1]

    # bf16 MXU data path; biases and all accumulation stay f32.
    x16 = x.astype(jnp.bfloat16)
    w1_16 = w1.astype(jnp.bfloat16)
    wh_16 = w_head.astype(jnp.bfloat16)

    # Pad batch only to the 8-row sublane granule (no round-up to tile size;
    # the ragged last grid block is clamped by the BlockSpec machinery and
    # its extra rows are sliced away below).
    b_pad = _round_up(max(B, 8), 8)
    TB_CAP = 1024  # a few MiB of VMEM even at 1024 rows — far under limits
    if b_pad >= 16:
        # Ensure >= 2 grid steps so the "parallel" axis feeds both v7x TCs.
        tb = min(TB_CAP, _round_up(pl.cdiv(b_pad, 2), 8))
    else:
        tb = b_pad
    grid = (pl.cdiv(b_pad, tb),)

    if b_pad != B:
        x16 = jnp.pad(x16, ((0, b_pad - B), (0, 0)))

    out_pi, out_v = pl.pallas_call(
        functools.partial(_actor_critic_kernel, n_actions),
        out_shape=(
            jax.ShapeDtypeStruct((b_pad, out_pad), jnp.bfloat16),  # pi lanes
            jax.ShapeDtypeStruct((b_pad, 1), jnp.float32),         # value
        ),
        grid=grid,
        in_specs=[
            pl.BlockSpec((tb, D), lambda i: (i, 0)),       # x: tiled over batch
            pl.BlockSpec((D, H), lambda i: (0, 0)),        # weights: resident
            pl.BlockSpec((1, H), lambda i: (0, 0)),
            pl.BlockSpec((H, out_pad), lambda i: (0, 0)),
            pl.BlockSpec((1, out_pad), lambda i: (0, 0)),
        ],
        out_specs=(
            pl.BlockSpec((tb, out_pad), lambda i: (i, 0)),
            pl.BlockSpec((tb, 1), lambda i: (i, 0)),
        ),
        compiler_params=pltpu.CompilerParams(
            dimension_semantics=("parallel",)),
    )(x16, w1_16, b1, wh_16, b_head)

    pi = out_pi[:B, :n_actions].astype(jnp.float32)
    v = out_v[:B, :]
    return pi, v


def init_params(key, input_size, n_actions, hidden=256):
    """Deterministic init mimicking nn.Linear default (U[-1/sqrt(fan_in), ...])."""
    ks = jax.random.split(key, 6)

    def uniform(k, shape, fan_in):
        bound = 1.0 / math.sqrt(fan_in)
        return jax.random.uniform(k, shape, jnp.float32, -bound, bound)

    # Stored transposed relative to PyTorch (in_features, out_features) so the
    # kernel computes x @ W directly.
    w1 = uniform(ks[0], (input_size, hidden), input_size)
    b1 = uniform(ks[1], (1, hidden), input_size)
    wpi = uniform(ks[2], (hidden, n_actions), hidden)
    bpi = uniform(ks[3], (1, n_actions), hidden)
    wv = uniform(ks[4], (hidden, 1), hidden)
    bv = uniform(ks[5], (1, 1), hidden)
    return w1, b1, wpi, bpi, wv, bv


if __name__ == "__main__":
    key = jax.random.PRNGKey(0)
    batch, input_size, n_actions = 2, 32, 8

    k_x, k_p = jax.random.split(key)
    x = jax.random.normal(k_x, (batch, input_size), jnp.float32)
    raw = init_params(k_p, input_size, n_actions)
    packed = pack_params(*raw)

    pi, v = actor_critic_forward(x, *packed, n_actions=n_actions)
    jax.block_until_ready((pi, v))

    assert pi.shape == (batch, n_actions)
    assert v.shape == (batch, 1)
    # pi is computed with a bf16 MXU data path and stored in bf16: rows sum to
    # 1 to within bf16 quantization of the stored probabilities.
    assert jnp.allclose(jnp.sum(pi, axis=-1), 1.0, atol=5e-3)

    # Pure-JAX f32 reference for correctness (bf16 path => loose tolerances).
    w1, b1, wpi, bpi, wv, bv = raw
    h_ref = jnp.maximum(x @ w1 + b1, 0.0)
    pi_ref = jax.nn.softmax(h_ref @ wpi + bpi, axis=-1)
    v_ref = h_ref @ wv + bv
    assert jnp.allclose(pi, pi_ref, atol=1.5e-2)
    assert jnp.allclose(v, v_ref, atol=2e-2)

    print("KERNEL_OK")
</pallas_src>

<mosaic_0001>
module attributes {stable_mosaic.version = 11 : i64} {
  func.func @_actor_critic_kernel(%arg0: i32, %arg1: memref<8x32xbf16, #tpu.memory_space<vmem>>, %arg2: memref<32x256xbf16, #tpu.memory_space<vmem>>, %arg3: memref<1x256xf32, #tpu.memory_space<vmem>>, %arg4: memref<256x128xbf16, #tpu.memory_space<vmem>>, %arg5: memref<1x128xf32, #tpu.memory_space<vmem>>, %arg6: memref<8x128xbf16, #tpu.memory_space<vmem>>, %arg7: memref<8x1xf32, #tpu.memory_space<vmem>>) attributes {dimension_semantics = [#tpu.dimension_semantics<parallel>], iteration_bounds = array<i64: 1>, scalar_prefetch = 0 : i64, scratch_operands = 0 : i64, tpu.core_type = #tpu.core_type<tc>, window_params = [{transform_indices = @transform_0, window_bounds = array<i64: 8, 32>}, {pipeline_mode = #tpu.pipeline_mode<synchronous>, transform_indices = @transform_1, window_bounds = array<i64: 32, 256>}, {pipeline_mode = #tpu.pipeline_mode<synchronous>, transform_indices = @transform_2, window_bounds = array<i64: 1, 256>}, {pipeline_mode = #tpu.pipeline_mode<synchronous>, transform_indices = @transform_3, window_bounds = array<i64: 256, 128>}, {pipeline_mode = #tpu.pipeline_mode<synchronous>, transform_indices = @transform_4, window_bounds = array<i64: 1, 128>}, {transform_indices = @transform_5, window_bounds = array<i64: 8, 128>}, {transform_indices = @transform_6, window_bounds = array<i64: 8, 1>}]} {
    %c0 = arith.constant 0 : index
    %c0_0 = arith.constant 0 : index
    %0 = vector.load %arg1[%c0, %c0_0] : memref<8x32xbf16, #tpu.memory_space<vmem>>, vector<8x32xbf16>
    %c0_1 = arith.constant 0 : index
    %c0_2 = arith.constant 0 : index
    %1 = vector.load %arg2[%c0_1, %c0_2] : memref<32x256xbf16, #tpu.memory_space<vmem>>, vector<32x256xbf16>
    %cst = arith.constant dense<0.000000e+00> : vector<8x256xf32>
    %2 = tpu.matmul %0, %1, %cst {dimension_numbers = #tpu.dot_dimension_numbers<[1], [0], [0], [1], [0, 0, 1, 1], [], []>} : vector<8x32xbf16>, vector<32x256xbf16>, vector<8x256xf32> -> vector<8x256xf32>
    %c0_3 = arith.constant 0 : index
    %c0_4 = arith.constant 0 : index
    %3 = vector.load %arg3[%c0_3, %c0_4] : memref<1x256xf32, #tpu.memory_space<vmem>>, vector<1x256xf32>
    %4 = vector.broadcast %3 : vector<1x256xf32> to vector<8x256xf32>
    %5 = arith.addf %2, %4 : vector<8x256xf32>
    %cst_5 = arith.constant 0.000000e+00 : f32
    %6 = vector.broadcast %cst_5 : f32 to vector<8x256xf32>
    %7 = arith.maximumf %5, %6 : vector<8x256xf32>
    %8 = arith.truncf %7 : vector<8x256xf32> to vector<8x256xbf16>
    %c0_6 = arith.constant 0 : index
    %c0_7 = arith.constant 0 : index
    %9 = vector.load %arg4[%c0_6, %c0_7] : memref<256x128xbf16, #tpu.memory_space<vmem>>, vector<256x128xbf16>
    %cst_8 = arith.constant dense<0.000000e+00> : vector<8x128xf32>
    %10 = tpu.matmul %8, %9, %cst_8 {dimension_numbers = #tpu.dot_dimension_numbers<[1], [0], [0], [1], [0, 0, 1, 1], [], []>} : vector<8x256xbf16>, vector<256x128xbf16>, vector<8x128xf32> -> vector<8x128xf32>
    %c0_9 = arith.constant 0 : index
    %c0_10 = arith.constant 0 : index
    %11 = vector.load %arg5[%c0_9, %c0_10] : memref<1x128xf32, #tpu.memory_space<vmem>>, vector<1x128xf32>
    %12 = vector.broadcast %11 : vector<1x128xf32> to vector<8x128xf32>
    %13 = arith.addf %10, %12 : vector<8x128xf32>
    %14 = tpu.iota {dimensions = array<i32: 1>} : vector<1x128xi32>
    %c8_i32 = arith.constant 8 : i32
    %15 = vector.broadcast %c8_i32 : i32 to vector<1x128xi32>
    %16 = arith.cmpi eq, %14, %15 : vector<1x128xi32>
    %cst_11 = arith.constant -1.000000e+30 : f32
    %17 = vector.shape_cast %16 : vector<1x128xi1> to vector<1x128xi1>
    %18 = vector.broadcast %17 : vector<1x128xi1> to vector<8x128xi1>
    %19 = vector.broadcast %cst_11 : f32 to vector<8x128xf32>
    %20 = arith.select %18, %19, %13 : vector<8x128xi1>, vector<8x128xf32>
    %cst_12 = arith.constant dense<0xFF800000> : vector<8xf32>
    %21 = vector.multi_reduction <maximumf>, %20, %cst_12 [1] : vector<8x128xf32> to vector<8xf32>
    %22 = vector.shape_cast %21 : vector<8xf32> to vector<8x1xf32>
    %23 = vector.broadcast %22 : vector<8x1xf32> to vector<8x128xf32>
    %24 = arith.subf %20, %23 : vector<8x128xf32>
    %25 = math.exp %24 : vector<8x128xf32>
    %cst_13 = arith.constant dense<0.000000e+00> : vector<8xf32>
    %26 = vector.multi_reduction <add>, %25, %cst_13 [1] : vector<8x128xf32> to vector<8xf32>
    %27 = vector.shape_cast %26 : vector<8xf32> to vector<8x1xf32>
    %28 = tpu.reciprocal %27 : vector<8x1xf32> -> vector<8x1xf32>
    %29 = vector.broadcast %28 : vector<8x1xf32> to vector<8x128xf32>
    %30 = arith.mulf %25, %29 : vector<8x128xf32>
    %31 = arith.truncf %30 : vector<8x128xf32> to vector<8x128xbf16>
    %c0_14 = arith.constant 0 : index
    %c0_15 = arith.constant 0 : index
    %32 = vector.load %arg6[%c0_14, %c0_15] : memref<8x128xbf16, #tpu.memory_space<vmem>>, vector<8x128xbf16>
    tpu.vector_store %arg6[%c0_14, %c0_15], %31 {strides = array<i32>} : memref<8x128xbf16, #tpu.memory_space<vmem>>, vector<8x128xbf16>,
    %cst_16 = arith.constant 0.000000e+00 : f32
    %33 = vector.shape_cast %16 : vector<1x128xi1> to vector<1x128xi1>
    %34 = vector.broadcast %33 : vector<1x128xi1> to vector<8x128xi1>
    %35 = vector.broadcast %cst_16 : f32 to vector<8x128xf32>
    %36 = arith.select %34, %13, %35 : vector<8x128xi1>, vector<8x128xf32>
    %cst_17 = arith.constant dense<0.000000e+00> : vector<8xf32>
    %37 = vector.multi_reduction <add>, %36, %cst_17 [1] : vector<8x128xf32> to vector<8xf32>
    %38 = vector.shape_cast %37 : vector<8xf32> to vector<8x1xf32>
    %c0_18 = arith.constant 0 : index
    %c0_19 = arith.constant 0 : index
    %39 = vector.load %arg7[%c0_18, %c0_19] : memref<8x1xf32, #tpu.memory_space<vmem>>, vector<8x1xf32>
    tpu.vector_store %arg7[%c0_18, %c0_19], %38 {strides = array<i32>} : memref<8x1xf32, #tpu.memory_space<vmem>>, vector<8x1xf32>,
    return
  }
  func.func @transform_0(%arg0: i32) -> (i32, i32) {
    %c0_i32 = arith.constant 0 : i32
    %c0_i32_0 = arith.constant 0 : i32
    return %arg0, %c0_i32 : i32, i32
  }
  func.func @transform_1(%arg0: i32) -> (i32, i32) {
    %c0_i32 = arith.constant 0 : i32
    %c0_i32_0 = arith.constant 0 : i32
    %c0_i32_1 = arith.constant 0 : i32
    return %c0_i32, %c0_i32_0 : i32, i32
  }
  func.func @transform_2(%arg0: i32) -> (i32, i32) {
    %c0_i32 = arith.constant 0 : i32
    %c0_i32_0 = arith.constant 0 : i32
    %c0_i32_1 = arith.constant 0 : i32
    return %c0_i32, %c0_i32_0 : i32, i32
  }
  func.func @transform_3(%arg0: i32) -> (i32, i32) {
    %c0_i32 = arith.constant 0 : i32
    %c0_i32_0 = arith.constant 0 : i32
    %c0_i32_1 = arith.constant 0 : i32
    return %c0_i32, %c0_i32_0 : i32, i32
  }
  func.func @transform_4(%arg0: i32) -> (i32, i32) {
    %c0_i32 = arith.constant 0 : i32
    %c0_i32_0 = arith.constant 0 : i32
    %c0_i32_1 = arith.constant 0 : i32
    return %c0_i32, %c0_i32_0 : i32, i32
  }
  func.func @transform_5(%arg0: i32) -> (i32, i32) {
    %c0_i32 = arith.constant 0 : i32
    %c0_i32_0 = arith.constant 0 : i32
    return %arg0, %c0_i32 : i32, i32
  }
  func.func @transform_6(%arg0: i32) -> (i32, i32) {
    %c0_i32 = arith.constant 0 : i32
    %c0_i32_0 = arith.constant 0 : i32
    return %arg0, %c0_i32 : i32, i32
  }
}

</mosaic_0001>

<bundles_post_ra>
// kernel: tpu_custom_call.1
= control target key start
LH: loop header
LB: loop body
LE: loop exit
PB: predicated region body
PF: predicated region fallthrough
CT: control target
= control target key end

     0   :  { %12 = vsyncpa [#allocation3], 0  ;;  %s673_s0 = inlined_call_operand.hbm [shape: bf16[8,32], index: 0, kind: input, shape index: {}]   ;;  %s674_s1 = inlined_call_operand.hbm [shape: bf16[32,256], index: 1, kind: input, shape index: {}]   ;;  %s675_s2 = inlined_call_operand.hbm [shape: f32[1,256], index: 2, kind: input, shape index: {}]   ;;  %s676_s3 = inlined_call_operand.hbm [shape: bf16[256,128], index: 3, kind: input, shape index: {}]   ;;  %s677_s4 = inlined_call_operand.vmem [shape: f32[1,128], index: 4, kind: input, shape index: {}]   ;;  %s678_s5 = inlined_call_operand.hbm [shape: bf16[8,128], index: 5, kind: output, shape index: {0}]   ;;  %s679_s6 = inlined_call_operand.vmem [shape: f32[8,1], index: 6, kind: output, shape index: {1}]  }
   0x1   :  { %13 = vsyncpa [#allocation6], 0 }
   0x2   :  { %14 = vsyncpa [#allocation9], 0  ;;  %s31_s23 = sshll.u32 %s674_s1, 4  ;;  %s32_s23 = int_to_ptr.hbm [resolvable:$true] %s31_s23 }
   0x3   :  { %15 = vsyncpa [#allocation4], 0  ;;  %s608_s24 = smov [#allocation5]   ;;  %s21_s28 = sshll.u32 %s673_s0, 4  ;;  %s22_s28 = int_to_ptr.hbm [resolvable:$true] %s21_s28 }
   0x4   :  { %s33_s25 = sshll.u32 %s608_s24, 4  ;;  %s609_s29 = smov 128   ;;  %s34_s25 = int_to_ptr.vmem [resolvable:$true] %s33_s25 }
   0x5   :  { %s610_s30 = smov 8   ;;  %s611_s7 = smov [#allocation2]  }
   0x6   :  { %39 = dma.hbm_to_vmem [thread:$0]  %s32_s23, 512, %s34_s25, [#allocation6], %s609_s29, %s609_s29, %s610_s30  }
   0x7   :  { %s23_s8 = sshll.u32 %s611_s7, 4  ;;  %s45_s11 = sshll.u32 %s675_s2, 4  ;;  %s24_s8 = int_to_ptr.vmem [resolvable:$true] %s23_s8  ;;  %s46_s11 = int_to_ptr.hbm [resolvable:$true] %s45_s11 }
   0x8   :  { %26 = dma.hbm_to_vmem [thread:$0]  %s22_s28, 64, %s24_s8, [#allocation3]  }
   0x9   :  { %s55_s13 = sshll.u32 %s676_s3, 4  ;;  %s612_s14 = smov [#allocation7]   ;;  %s56_s13 = int_to_ptr.hbm [resolvable:$true] %s55_s13 }
   0xa   :  { %s47_s15 = sshll.u32 %s612_s14, 4  ;;  %s613_s0 = smov [#allocation8]   ;;  %s48_s15 = int_to_ptr.vmem [resolvable:$true] %s47_s15 }
   0xb   :  { %50 = dma.hbm_to_vmem [thread:$0]  %s46_s11, 32, %s48_s15, [#allocation6]  }
   0xc   :  { %s57_s16 = sshll.u32 %s613_s0, 4  ;;  %s614_s17 = smov 64   ;;  %s58_s16 = int_to_ptr.vmem [resolvable:$true] %s57_s16 }
   0xd   :  { %s615_s18 = smov 4  }
   0xe   :  { %63 = dma.hbm_to_vmem [thread:$0]  %s56_s13, 2048, %s58_s16, [#allocation9], %s614_s17, %s614_s17, %s615_s18  }
   0xf   :  { %600 = dma.done.wait [#allocation3], 64  }
  0x10   :  { %601 = vsyncadd [#allocation3], 4294967232 }
  0x11   :  { %602 = dma.done.wait [#allocation6], 544  }
  0x12   :  { %603 = vsyncadd [#allocation6], 4294966752 }
  0x13   :  { %604 = dma.done.wait [#allocation9], 2048  }
  0x14   :  { %605 = vsyncadd [#allocation9], 4294965248  ;;  %v374_v0 = vld [vmem:[#allocation5 + $0x10] sm:$0xf]  ;;  %v449_v1 = vld [vmem:[#allocation5 + $0x14] sm:$0xf0]  ;;  %v306_v42 = vlaneseq }
  0x15   :  { %v448_v2 = vld [vmem:[#allocation5 + $0x14] sm:$0xf]  ;;  %v375_v3 = vor.u32 %v449_v1, %v374_v0  ;;  %v376_v4 = vld [vmem:[#allocation5 + $0x18] sm:$0xf0]  ;;  %v366_v5 = vld [vmem:[#allocation5] sm:$0xf] }
  0x16   :  { %v447_v6 = vld [vmem:[#allocation5 + $0x4] sm:$0xf0]  ;;  %v379_v7 = vor.u32 %v448_v2, %v376_v4  ;;  %v446_v8 = vld [vmem:[#allocation5 + $0x4] sm:$0xf]  ;;  %v368_v9 = vld [vmem:[#allocation5 + $0x8] sm:$0xf0] }
  0x17   :  { %124 = vmatpush.bf16.msra.mxu0 %v375_v3  ;;  %v367_v10 = vor.u32 %v447_v6, %v366_v5  ;;  %v457_v11 = vld [vmem:[#allocation8 + $0x38] sm:$0xff]  ;;  %v371_v13 = vor.u32 %v446_v8, %v368_v9  ;;  %v456_v14 = vld [vmem:[#allocation8 + $0x30] sm:$0xff]  ;;  %vm114_vm0 = vcmask 261120   ;;  %v455_v17 = vld [vmem:[#allocation8 + $0x28] sm:$0xff]  ;;  %v307_v44 = vand.u32 127, %v306_v42  ;;  %s348_s23 = sshll.u32 %s678_s5, 4  ;;  %s349_s23 = int_to_ptr.hbm [resolvable:$true] %s348_s23 }
  0x18   :  { %v465_v12 = vld [vmem:[#allocation8 + $0x78] sm:$0xff]  ;;  %137 = vmatpush.bf16.msra.mxu1 %v379_v7  ;;  %280 = vmatpush.bf16.msra.mxu2 %v457_v11  ;;  %v464_v15 = vld [vmem:[#allocation8 + $0x70] sm:$0xff]  ;;  %v463_v18 = vld [vmem:[#allocation8 + $0x68] sm:$0xff]  ;;  %vm339_vm2 = vcmask 7168  }
  0x19   :  { %293 = vmatpush.bf16.msra.mxu3 %v465_v12  ;;  %v83_v16 = vld [vmem:[#allocation2] sm:$0xf]  ;;  %v454_v19 = vld [vmem:[#allocation8 + $0x20] sm:$0xff]  ;;  %v452_v23 = vld [vmem:[#allocation8 + $0x10] sm:$0xff]  ;;  %vm308_vm1 = vcmp.eq.s32.totalorder %v307_v44, 8 }
  0x1a   :  { %v462_v20 = vld [vmem:[#allocation8 + $0x60] sm:$0xff]  ;;  %v453_v21 = vld [vmem:[#allocation8 + $0x18] sm:$0xff]  ;;  %v460_v24 = vld [vmem:[#allocation8 + $0x50] sm:$0xff] }
  0x1b   :  { %125 = vmatpush.bf16.msra.mxu0 %v367_v10  ;;  %v461_v22 = vld [vmem:[#allocation8 + $0x58] sm:$0xff]  ;;  %v451_v25 = vld [vmem:[#allocation8 + $0x8] sm:$0xff]  ;;  %v450_v27 = vld [vmem:[#allocation8] sm:$0xff] }
  0x1c   :  { %138 = vmatpush.bf16.msra.mxu1 %v371_v13  ;;  %281 = vmatpush.bf16.msra.mxu2 %v456_v14  ;;  %v459_v26 = vld [vmem:[#allocation8 + $0x48] sm:$0xff]  ;;  %v458_v28 = vld [vmem:[#allocation8 + $0x40] sm:$0xff]  ;;  %v88_v29 = vld [vmem:[#allocation7] sm:$0x3] }
  0x1d   :  { %294 = vmatpush.bf16.msra.mxu3 %v464_v15  ;;  %v90_v30 = vperm.slane %v88_v29, 0  ;;  %v91_v31 = vperm.slane %v88_v29, 1  ;;  %v475_v43 = vld [vmem:[%s677_s4] ss:$0 sm:$0xff]  ;;  %s616_s4 = smov [#allocation10]  }
  0x1e   :  { %380 = vmatmul.msk.bf16.vlgmr.msra.gmra.mxu0 %vm114_vm0, %v83_v16 }
  0x1f   :  { %381 = vmatmul.msk.bf16.vlgmr.msra.gmra.mxu1 %vm114_vm0, %v83_v16 }
  0x20   :  { %282 = vmatpush.bf16.msra.mxu2 %v455_v17 }
  0x21   :  { %295 = vmatpush.bf16.msra.mxu3 %v463_v18 }
  0x24   :  { %283 = vmatpush.bf16.msra.mxu2 %v454_v19 }
  0x25   :  { %296 = vmatpush.bf16.msra.mxu3 %v462_v20 }
  0x28   :  { %284 = vmatpush.bf16.msra.mxu2 %v453_v21 }
  0x29   :  { %297 = vmatpush.bf16.msra.mxu3 %v461_v22 }
  0x2c   :  { %285 = vmatpush.bf16.msra.mxu2 %v452_v23 }
  0x2d   :  { %298 = vmatpush.bf16.msra.mxu3 %v460_v24 }
  0x30   :  { %286 = vmatpush.bf16.msra.mxu2 %v451_v25 }
  0x31   :  { %299 = vmatpush.bf16.msra.mxu3 %v459_v26 }
  0x34   :  { %287 = vmatpush.bf16.msra.mxu2 %v450_v27 }
  0x35   :  { %300 = vmatpush.bf16.msra.mxu3 %v458_v28 }
  0x9b   :  { %v127_v32 = vpop.f32.mrf.mxu0 }
  0x9c   :  { %v128_v33 = vadd.f32 %v127_v32, %v90_v30  ;;  %v140_v34 = vpop.f32.mrf.mxu1 }
  0x9d   :  { %v141_v35 = vadd.f32 %v140_v34, %v91_v31 }
  0x9e   :  { %v144_v36 = vmax.f32 %v128_v33, 0.0 }
  0x9f   :  { %v145_v37 = vmax.f32 %v141_v35, 0.0 }
  0xa0   :  { %v146_v38 = vpack.c.bf16 %v144_v36, %v144_v36 }
  0xa1   :  { %v147_v39 = vpack.c.bf16 %v145_v37, %v145_v37 }
  0xa2   :  { %288 = vmatmul.bf16.vlgmr.msra.gmra.mxu2 %v146_v38 }
  0xa3   :  { %301 = vmatmul.bf16.vlgmr.msra.gmra.mxu3 %v147_v39  ;;  %v129_v40 = vpop.f32.mrf.mxu0 }
  0xa4   :  { %v142_v41 = vpop.f32.mrf.mxu1 }
 0x125   :  { %v289_v45 = vpop.f32.mrf.mxu2 }
 0x126   :  { %v290_v46 = vadd.f32 %v475_v43, %v289_v45  ;;  %v302_v47 = vpop.f32.mrf.mxu3 }
 0x128   :  { %v303_v48 = vadd.f32 %v302_v47, %v290_v46 }
 0x12a   :  { %v336_v49 = vsel %vm308_vm1, %v303_v48, 0.0  ;;  %v311_v50 = vsel %vm308_vm1, -1e+30, %v303_v48 }
 0x12b   :  { %337 = vadd.xlane.f32.xlu1 %v336_v49  ;;  %312 = vmax.xlane.f32.xlu0 %v311_v50 }
 0x12d   :  { %v291_v51 = vpop.f32.mrf.mxu2 }
 0x12e   :  { %v304_v52 = vpop.f32.mrf.mxu3 }
 0x19e   :  { %v338_v53 = vpop.xlane.xlu1 %337  ;;  %v313_v54 = vpop.xlane.xlu0 %312 }
 0x19f   :  { %340 = vst.msk [vmem:[%s679_s6] sm:$0xff] %vm339_vm2, %v338_v53  ;;  %v314_v55 = vsub.f32 %v311_v50, %v313_v54  ;;  %s346_s6 = sshll.u32 %s616_s4, 4  ;;  %s347_s6 = int_to_ptr.vmem [resolvable:$true] %s346_s6 }
 0x1a1   :  { %v315_v56 = vmul.f32 1.442695, %v314_v55 }
 0x1a3   :  { %476 = vpow2.f32 %v315_v56 }
 0x1a9   :  { %v477_v57 = vpop.eup %476 }
 0x1aa   :  { %317 = vadd.xlane.f32.xlu0 %v477_v57 }
 0x21d   :  { %v318_v58 = vpop.xlane.xlu0 %317 }
 0x21e   :  { %478 = vrcp.f32 %v318_v58  ;;  %v330_v62 = vand.u32 2147483648, %v318_v58  ;;  %v328_v0 = vand.u32 2147483647, %v318_v58  ;;  %vm324_vm4 = vweird.f32 %v318_v58 }
 0x220   :  { %v331_v2 = vor.u32 1.1754944e-38, %v330_v62  ;;  %vm329_vm6 = vcmp.eq.f32.partialorder %v328_v0, 8.507059e+37 }
 0x224   :  { %v479_v59 = vpop.eup %478 }
 0x225   :  { %v320_v60 = vmul.f32 %v479_v59, %v318_v58  ;;  %vm325_vm3 = vweird.f32 %v479_v59 }
 0x226   :  { %vm326_vm5 = vmor %vm324_vm4, %vm325_vm3 }
 0x227   :  { %v321_v61 = vsub.f32 1.0, %v320_v60 }
 0x229   :  { %v322_v63 = vmul.f32 %v479_v59, %v321_v61 }
 0x22b   :  { %v323_v1 = vadd.f32 %v479_v59, %v322_v63 }
 0x22d   :  { %v327_v3 = vsel %vm326_vm5, %v479_v59, %v323_v1 }
 0x22e   :  { %v332_v4 = vsel %vm329_vm6, %v331_v2, %v327_v3 }
 0x22f   :  { %v333_v5 = vmul.f32 %v477_v57, %v332_v4 }
 0x231   :  { %v334_v6 = vpack.c.bf16 %v333_v5, %v333_v5 }
 0x233   :  { %335 = vst [vmem:[#allocation10] sm:$0xf] %v334_v6 }
 0x234   :  { %351 = dma.vmem_to_hbm [thread:$0]  %s347_s6, 64, %s349_s23, [#allocation4]  }
 0x235   :  { %606 = dma.done.wait [#allocation4], 64  }
 0x236   :  { %607 = vsyncadd [#allocation4], 4294967232 }
 0x237   :  { %360 = vsyncpa [#allocation3], 1 }
 0x238   :  { %361 = vsyncpa [#allocation6], 1 }
 0x239   :  { %362 = vsyncpa [#allocation9], 1 }
 0x23a   :  { %363 = vsyncpa [#allocation4], 1 }

</bundles_post_ra>
